<compile_context>
chip_gen: v6e
topology: v6e:2x2x1
jax: 0.10.0
libtpu: 0.0.40
codegen_flags: <defaults>
</compile_context>

<pallas_src>
import functools

import jax
import jax.numpy as jnp
from jax import lax
from jax.experimental import pallas as pl
from jax.experimental.pallas import tpu as pltpu


def _ohem_ce_kernel(logits_ref, target_ref, out_ref, *, ignore_label, flag):
    # logits_ref: (C, TP) input dtype; target_ref: (1, TP) i32
    # out_ref: (2, TP) f32 -- row 0 = pixel CE loss, row 1 = target-class conf
    logits = logits_ref[...].astype(jnp.float32)
    tgt = target_ref[...]                                    # (1, TP)
    valid = tgt != ignore_label
    tmp_tgt = jnp.where(valid, tgt, 0)                       # ignore -> class 0

    # numerically stable log-sum-exp over the class (sublane) axis
    m = jnp.max(logits, axis=0, keepdims=True)               # (1, TP)
    shifted = logits - m
    den = jnp.sum(jnp.exp(shifted), axis=0, keepdims=True)   # sum of exps, in [1, C]

    onehot = lax.broadcasted_iota(jnp.int32, logits.shape, 0) == tmp_tgt
    g_shift = jnp.sum(jnp.where(onehot, shifted, 0.0), axis=0, keepdims=True)

    # raw per-pixel CE (>= 0); nn.CrossEntropyLoss(reduction='none',
    # ignore_index) gives 0 at ignored pixels, so mask for the loss output.
    loss_raw = jnp.log(den) - g_shift
    loss = jnp.where(valid, loss_raw, 0.0)

    if flag:   # softmax prob at target class == exp(-CE); single EUP op
        prob = jnp.exp(-loss_raw)
    else:      # raw logit at target class (pred = s_i in the reference)
        prob = g_shift + m

    out_ref[0:1, :] = loss
    out_ref[1:2, :] = prob


def _pick_tile(C, HW, requested):
    """Lane-tile width: big enough to approach the HBM roofline, small enough
    that the double-buffered (C, tile) logits blocks plus f32 temps stay well
    inside the scoped-VMEM budget on v5e / v6e / v7x."""
    if requested is None:
        tile = (2 * 1024 * 1024) // max(4 * C, 1)   # ~2 MiB of f32 per block
        tile = min(tile, 32768)
    else:
        tile = requested
    hw_ceil = ((HW + 127) // 128) * 128
    tile = min(tile, hw_ceil)
    tile = max(128, (tile // 128) * 128)
    return tile


@functools.partial(jax.jit,
                   static_argnames=("flag", "ignore_label", "thres",
                                    "min_kept", "tile"))
def ohem_cross_entropy(s_i, target, flag=True, *, ignore_label=-1, thres=0.7,
                       min_kept=100000, tile=None):
    """s_i: (N, C, H, W) float logits (NCHW, like PyTorch). target: (N, h, w) int."""
    min_kept = max(1, min_kept)
    N, C, H, W = s_i.shape
    h, w = target.shape[1], target.shape[2]
    if (H, W) != (h, w):
        # glue: F.upsample(mode='bilinear', align_corners=False) equivalent
        s_i = jax.image.resize(s_i, (N, C, h, w), method="bilinear")

    HW = h * w
    logits = s_i.reshape(N, C, HW)        # free view of NCHW; no transpose/copy
    tile = _pick_tile(C, HW, tile)
    HW_pad = ((HW + tile - 1) // tile) * tile
    n_tiles = HW_pad // tile

    tgt = target.reshape(N, 1, HW).astype(jnp.int32)
    if HW_pad != HW:
        # pad only the cheap target; the logits' ragged last block hangs over
        # the array edge and its garbage lanes are masked via ignore_label.
        tgt = jnp.pad(tgt, ((0, 0), (0, 0), (0, HW_pad - HW)),
                      constant_values=ignore_label)

    kernel = functools.partial(_ohem_ce_kernel,
                               ignore_label=ignore_label, flag=flag)
    cost = pl.CostEstimate(
        flops=int(6 * C * N * HW),
        transcendentals=int((C + 2) * N * HW),
        bytes_accessed=int(N * HW * (C * logits.dtype.itemsize + 4 + 8)),
    )
    out = pl.pallas_call(
        kernel,
        out_shape=jax.ShapeDtypeStruct((N, 2, HW_pad), jnp.float32),
        grid=(N, n_tiles),
        in_specs=[pl.BlockSpec((None, C, tile), lambda n, i: (n, 0, i)),
                  pl.BlockSpec((None, 1, tile), lambda n, i: (n, 0, i))],
        out_specs=pl.BlockSpec((None, 2, tile), lambda n, i: (n, 0, i)),
        compiler_params=pltpu.CompilerParams(
            dimension_semantics=("parallel", "parallel"),
            vmem_limit_bytes=32 * 1024 * 1024),
        cost_estimate=cost,
    )(logits, tgt)

    loss_flat = out[:, 0, :].reshape(-1)
    prob_flat = out[:, 1, :].reshape(-1)
    mask = tgt.reshape(-1) != ignore_label

    num_valid = jnp.sum(mask.astype(jnp.int32))
    prob_masked = jnp.where(mask, prob_flat, jnp.inf)   # invalid/padded -> +inf

    # k-th smallest confidence via top_k instead of a full O(P log P) argsort.
    total = prob_masked.shape[0]
    k = min(min_kept + 1, total)
    neg_topk, _ = lax.top_k(-prob_masked, k)            # k smallest probs
    smallest = -neg_topk                                 # ascending order
    idx = jnp.clip(jnp.minimum(min_kept, num_valid - 1), 0, k - 1)
    min_value = smallest[idx]
    threshold = jnp.maximum(min_value, jnp.float32(thres))

    keep = prob_masked < threshold                       # strict '<' like ref
    kept_sum = jnp.sum(jnp.where(keep, loss_flat, 0.0))
    kept_cnt = jnp.sum(keep.astype(jnp.float32))

    # TODO(synk): per-class `weight` of nn.CrossEntropyLoss not supported
    # (module default is weight=None, which is what is implemented).
    # Guard: empty selection (all ignored / every prob >= threshold) returns
    # 0.0 instead of the NaN / index error the PyTorch reference would hit.
    return kept_sum / jnp.maximum(kept_cnt, 1.0)


if __name__ == "__main__":
    key = jax.random.PRNGKey(0)
    k_logits, k_target, k_ignore = jax.random.split(key, 3)

    N, C, H, W = 2, 4, 16, 16
    s_i = jax.random.normal(k_logits, (N, C, H, W), dtype=jnp.float32)
    target = jax.random.randint(k_target, (N, H, W), 0, C, dtype=jnp.int32)
    # sprinkle some ignored pixels (label -1)
    target = jnp.where(jax.random.uniform(k_ignore, (N, H, W)) < 0.1,
                       jnp.int32(-1), target)

    out = ohem_cross_entropy(s_i, target, flag=True,
                             ignore_label=-1, thres=0.7, min_kept=100000)
    jax.block_until_ready(out)
    assert jnp.isfinite(out), "expected a finite OHEM loss"
    print("KERNEL_OK")
</pallas_src>

<mosaic_0001>
module attributes {stable_mosaic.version = 11 : i64} {
  func.func @_ohem_ce_kernel(%arg0: i32, %arg1: i32, %arg2: memref<1x4x256xf32, #tpu.memory_space<vmem>>, %arg3: memref<1x1x256xi32, #tpu.memory_space<vmem>>, %arg4: memref<1x2x256xf32, #tpu.memory_space<vmem>>) attributes {dimension_semantics = [#tpu.dimension_semantics<parallel>, #tpu.dimension_semantics<parallel>], iteration_bounds = array<i64: 2, 1>, scalar_prefetch = 0 : i64, scratch_operands = 0 : i64, tpu.core_type = #tpu.core_type<tc>, window_params = [{transform_indices = @transform_0, window_bounds = array<i64: 1, 4, 256>}, {transform_indices = @transform_1, window_bounds = array<i64: 1, 1, 256>}, {transform_indices = @transform_2, window_bounds = array<i64: 1, 2, 256>}]} {
    %c0 = arith.constant 0 : index
    %c0_0 = arith.constant 0 : index
    %c0_1 = arith.constant 0 : index
    %0 = vector.load %arg2[%c0, %c0_0, %c0_1] : memref<1x4x256xf32, #tpu.memory_space<vmem>>, vector<1x4x256xf32>
    %1 = vector.shape_cast %0 : vector<1x4x256xf32> to vector<4x256xf32>
    %c0_2 = arith.constant 0 : index
    %c0_3 = arith.constant 0 : index
    %c0_4 = arith.constant 0 : index
    %2 = vector.load %arg3[%c0_2, %c0_3, %c0_4] : memref<1x1x256xi32, #tpu.memory_space<vmem>>, vector<1x1x256xi32>
    %3 = vector.shape_cast %2 : vector<1x1x256xi32> to vector<1x256xi32>
    %c-1_i32 = arith.constant -1 : i32
    %4 = vector.broadcast %c-1_i32 : i32 to vector<1x256xi32>
    %5 = arith.cmpi ne, %3, %4 : vector<1x256xi32>
    %c0_i32 = arith.constant 0 : i32
    %6 = vector.broadcast %c0_i32 : i32 to vector<1x256xi32>
    %7 = arith.select %5, %3, %6 : vector<1x256xi1>, vector<1x256xi32>
    %cst = arith.constant dense<0xFF800000> : vector<256xf32>
    %8 = vector.multi_reduction <maximumf>, %1, %cst [0] : vector<4x256xf32> to vector<256xf32>
    %9 = vector.shape_cast %8 : vector<256xf32> to vector<1x256xf32>
    %10 = vector.broadcast %9 : vector<1x256xf32> to vector<4x256xf32>
    %11 = arith.subf %1, %10 : vector<4x256xf32>
    %12 = math.exp %11 : vector<4x256xf32>
    %cst_5 = arith.constant dense<0.000000e+00> : vector<256xf32>
    %13 = vector.multi_reduction <add>, %12, %cst_5 [0] : vector<4x256xf32> to vector<256xf32>
    %14 = vector.shape_cast %13 : vector<256xf32> to vector<1x256xf32>
    %15 = tpu.iota {dimensions = array<i32: 0>} : vector<4x256xi32>
    %16 = vector.broadcast %7 : vector<1x256xi32> to vector<4x256xi32>
    %17 = arith.cmpi eq, %15, %16 : vector<4x256xi32>
    %cst_6 = arith.constant 0.000000e+00 : f32
    %18 = vector.broadcast %cst_6 : f32 to vector<4x256xf32>
    %19 = arith.select %17, %11, %18 : vector<4x256xi1>, vector<4x256xf32>
    %cst_7 = arith.constant dense<0.000000e+00> : vector<256xf32>
    %20 = vector.multi_reduction <add>, %19, %cst_7 [0] : vector<4x256xf32> to vector<256xf32>
    %21 = vector.shape_cast %20 : vector<256xf32> to vector<1x256xf32>
    %22 = math.log %14 : vector<1x256xf32>
    %23 = arith.subf %22, %21 : vector<1x256xf32>
    %cst_8 = arith.constant 0.000000e+00 : f32
    %24 = vector.broadcast %cst_8 : f32 to vector<1x256xf32>
    %25 = arith.select %5, %23, %24 : vector<1x256xi1>, vector<1x256xf32>
    %cst_9 = arith.constant 0.000000e+00 : f32
    %26 = vector.broadcast %cst_9 : f32 to vector<1x256xf32>
    %27 = arith.subf %26, %23 : vector<1x256xf32>
    %28 = math.exp %27 : vector<1x256xf32>
    %c0_10 = arith.constant 0 : index
    %c0_11 = arith.constant 0 : index
    %c0_12 = arith.constant 0 : index
    %29 = vector.load %arg4[%c0_10, %c0_11, %c0_12] : memref<1x2x256xf32, #tpu.memory_space<vmem>>, vector<1x1x256xf32>
    %30 = vector.shape_cast %29 : vector<1x1x256xf32> to vector<1x256xf32>
    %31 = vector.shape_cast %25 : vector<1x256xf32> to vector<1x1x256xf32>
    tpu.vector_store %arg4[%c0_10, %c0_11, %c0_12], %31 {strides = array<i32>} : memref<1x2x256xf32, #tpu.memory_space<vmem>>, vector<1x1x256xf32>,
    %c0_13 = arith.constant 0 : index
    %c1 = arith.constant 1 : index
    %c0_14 = arith.constant 0 : index
    %32 = vector.load %arg4[%c0_13, %c1, %c0_14] : memref<1x2x256xf32, #tpu.memory_space<vmem>>, vector<1x1x256xf32>
    %33 = vector.shape_cast %32 : vector<1x1x256xf32> to vector<1x256xf32>
    %34 = vector.shape_cast %28 : vector<1x256xf32> to vector<1x1x256xf32>
    tpu.vector_store %arg4[%c0_13, %c1, %c0_14], %34 {strides = array<i32>} : memref<1x2x256xf32, #tpu.memory_space<vmem>>, vector<1x1x256xf32>,
    return
  }
  func.func @transform_0(%arg0: i32, %arg1: i32) -> (i32, i32, i32) {
    %c0_i32 = arith.constant 0 : i32
    %c0_i32_0 = arith.constant 0 : i32
    return %arg0, %c0_i32, %arg1 : i32, i32, i32
  }
  func.func @transform_1(%arg0: i32, %arg1: i32) -> (i32, i32, i32) {
    %c0_i32 = arith.constant 0 : i32
    %c0_i32_0 = arith.constant 0 : i32
    return %arg0, %c0_i32, %arg1 : i32, i32, i32
  }
  func.func @transform_2(%arg0: i32, %arg1: i32) -> (i32, i32, i32) {
    %c0_i32 = arith.constant 0 : i32
    %c0_i32_0 = arith.constant 0 : i32
    return %arg0, %c0_i32, %arg1 : i32, i32, i32
  }
}

</mosaic_0001>

<bundles_post_ra>
// kernel: neg.3
= control target key start
LH: loop header
LB: loop body
LE: loop exit
PB: predicated region body
PF: predicated region fallthrough
CT: control target
= control target key end

     0   :  { %s24_s0 = inlined_call_operand.vmem [shape: f32[512], index: 0, kind: input, shape index: {}]   ;;  %s25_s1 = inlined_call_operand.vmem [shape: f32[512], index: 1, kind: output, shape index: {}]  }
   0x1   :  { %v2_v0 = vld [vmem:[%s24_s0] sm:$0xf] }
   0x2   :  { %v5_v1 = vxor.u32 2147483648, %v2_v0 }
   0x4   :  { %7 = vst [vmem:[%s25_s1] sm:$0xf] %v5_v1 }

// kernel: ohem_cross_entropy.1
= control target key start
LH: loop header
LB: loop body
LE: loop exit
PB: predicated region body
PF: predicated region fallthrough
CT: control target
= control target key end

     0   :  { %s542_s9 = smov 0   ;;  %s544_s10 = smov 0   ;;  %s599_s0 = inlined_call_operand.vmem [shape: f32[2,4,256], index: 0, kind: input, shape index: {}]   ;;  %s600_s1 = inlined_call_operand.vmem [shape: s32[2,1,256], index: 1, kind: input, shape index: {}]   ;;  %s601_s2 = inlined_call_operand.vmem [shape: f32[2,2,256], index: 2, kind: output, shape index: {}]  }
   0x1   :  { %s546_s11 = smov 0  }
   0x2 LB: > { %s24_s12 = sadd.s32 1, %s520_s10  ;;  %p455_p0 = scmp.ge.s32.totalorder %s524_s11, 1  ;;  %s524_s11 = sphi %s546_s11, %s12_s11   ;;  %s520_s10 = sphi %s544_s10, %s603_s10   ;;  %s516_s9 = sphi %s542_s9, %s602_s9  }
   0x3   : > { %p26_p1 = scmp.ge.s32.totalorder %s24_s12, 2  ;;  %p149_p2 = scmp.lt.s32.totalorder %s524_s11, 3 }
   0x5   : > { %s605_s12 = smov (%p26_p1, %s24_s12), 0  ;;  %p150_p3 = pnand %p455_p0, %p149_p2 }
   0x6   : > { %p188_p4 = scmp.lt.s32.totalorder (!%p150_p3), %s516_s9, 1 }
   0x7   : > { %153 = sbr.rel (%p150_p3) target bundleno = 109 (0x6d), region = 28 }
   0xc   : > { %s607_s9 = smov (!%p188_p4, %s516_s9), 1  ;;  %vm223_vm0 = vcmask 1043456   ;;  %v262_v17 = vlaneseq  ;;  %v526_v58 = vmov 1966171168  }
   0xd   : > { %s464_s13 = sshll.u32 %s607_s9, 3  ;;  %s458_s17 = sshll.u32 %s607_s9, 1  ;;  %v303_v59 = vunpack.c.l.s4 %v526_v58 }
   0xe   : > { %s195_s16 = scalar_lea.vmem %s599_s0, %s464_s13  ;;  %s204_s20 = scalar_lea.vmem %s600_s1, %s458_s17  ;;  %v263_v21 = vshrl.u32 %v262_v17, 7  ;;  %vm326_vm4 = vcmp.lt.s32.totalorder %v262_v17, 256 }
   0xf   : > { %v216_v0 = vld [vmem:[%s195_s16] sm:$0xff]  ;;  %s465_s21 = sshll.u32 %s607_s9, 2 }
  0x10   : > { %v221_v1 = vcombine.high %v216_v0, %v216_v0  ;;  %v224_v2 = vsel %vm223_vm0, %v216_v0, -inf  ;;  %v572_v19 = vld [vmem:[%s204_s20] sm:$0x3]  ;;  %v266_v22 = vsub.s32 0, %v263_v21  ;;  %v270_v24 = vsub.s32 1, %v263_v21  ;;  %s214_s24 = scalar_lea.vmem %s601_s2, %s465_s21 }
  0x11   : > { %v225_v3 = vrot.slane %v224_v2, 4  ;;  %vm218_vm1 = vcmp.ne.s32.totalorder %v572_v19, 4294967295 }
  0x12   : > { %v231_v4 = vsel %vm223_vm0, %v221_v1, -inf  ;;  %v219_v23 = vsel %vm218_vm1, %v572_v19, 0 }
  0x13   : > { %v226_v5 = vmax.f32 %v224_v2, %v225_v3  ;;  %v232_v6 = vrot.slane %v231_v4, 4  ;;  %v267_v25 = vrot.slane %v219_v23, %v266_v22  ;;  %v271_v26 = vrot.slane %v219_v23, %v270_v24 }
  0x15   : > { %v227_v7 = vrot.slane %v226_v5, 2  ;;  %v233_v8 = vmax.f32 %v231_v4, %v232_v6  ;;  %vm272_vm2 = vcmp.eq.s32.totalorder %v263_v21, %v267_v25  ;;  %vm273_vm3 = vcmp.eq.s32.totalorder %v263_v21, %v271_v26 }
  0x17   : > { %v228_v9 = vmax.f32 %v226_v5, %v227_v7  ;;  %v234_v10 = vrot.slane %v233_v8, 2 }
  0x19   : > { %v229_v11 = vrot.slane %v228_v9, 1  ;;  %v235_v12 = vmax.f32 %v233_v8, %v234_v10 }
  0x1b   : > { %v230_v13 = vmax.f32 %v228_v9, %v229_v11  ;;  %v236_v14 = vrot.slane %v235_v12, 1 }
  0x1d   : > { %v237_v15 = vmax.f32 %v235_v12, %v236_v14 }
  0x1f   : > { %v240_v16 = vcombine.low %v230_v13, %v237_v15 }
  0x21   : > { %v242_v18 = vsub.f32 %v216_v0, %v240_v16  ;;  %v304_v0 = vunpack.c.0.s8 %v303_v59 }
  0x23   : > { %v243_v20 = vmul.f32 1.442695, %v242_v18  ;;  %v275_v27 = vcombine.high %v242_v18, %v242_v18  ;;  %v277_v29 = vsel %vm272_vm2, %v242_v18, 0.0  ;;  %v307_v5 = vsub.s32 %v304_v0, %v263_v21 }
  0x24   : > { %v279_v35 = vsel %vm223_vm0, %v277_v29, 0.0 }
  0x25   : > { %492 = vpow2.f32 %v243_v20  ;;  %v278_v33 = vsel %vm273_vm3, %v275_v27, 0.0  ;;  %v280_v41 = vrot.slane %v279_v35, 4 }
  0x26   : > { %v286_v38 = vsel %vm223_vm0, %v278_v33, 0.0 }
  0x27   : > { %v287_v44 = vrot.slane %v286_v38, 4  ;;  %v281_v47 = vadd.f32 %v280_v41, %v279_v35 }
  0x29   : > { %v288_v50 = vadd.f32 %v287_v44, %v286_v38  ;;  %v282_v52 = vrot.slane %v281_v47, 2 }
  0x2b   : > { %v289_v53 = vrot.slane %v288_v50, 2  ;;  %v283_v54 = vadd.f32 %v282_v52, %v281_v47 }
  0x2d   : > { %v290_v55 = vadd.f32 %v289_v53, %v288_v50  ;;  %v284_v56 = vrot.slane %v283_v54, 1 }
  0x2f   : > { %v291_v57 = vrot.slane %v290_v55, 1  ;;  %v285_v60 = vadd.f32 %v284_v56, %v283_v54 }
  0x31   : > { %v292_v62 = vadd.f32 %v291_v57, %v290_v55 }
  0x32   : > { %v493_v28 = vpop.eup %492 }
  0x33   : > { %v246_v30 = vcombine.high %v493_v28, %v493_v28  ;;  %v248_v31 = vsel %vm223_vm0, %v493_v28, 0.0 }
  0x34   : > { %v249_v32 = vrot.slane %v248_v31, 4 }
  0x35   : > { %v255_v34 = vsel %vm223_vm0, %v246_v30, 0.0 }
  0x36   : > { %v250_v36 = vadd.f32 %v249_v32, %v248_v31  ;;  %v256_v37 = vrot.slane %v255_v34, 4 }
  0x38   : > { %v251_v39 = vrot.slane %v250_v36, 2  ;;  %v257_v40 = vadd.f32 %v256_v37, %v255_v34 }
  0x3a   : > { %v252_v42 = vadd.f32 %v251_v39, %v250_v36  ;;  %v258_v43 = vrot.slane %v257_v40, 2 }
  0x3c   : > { %v253_v45 = vrot.slane %v252_v42, 1  ;;  %v259_v46 = vadd.f32 %v258_v43, %v257_v40 }
  0x3e   : > { %v254_v48 = vadd.f32 %v253_v45, %v252_v42  ;;  %v260_v49 = vrot.slane %v259_v46, 1 }
  0x40   : > { %v261_v51 = vadd.f32 %v260_v49, %v259_v46  ;;  %494 = vlog2.f32 %v254_v48 }
  0x42   : > { %496 = vlog2.f32 %v261_v51 }
  0x4d   : > { %v495_v61 = vpop.eup %494 }
  0x4e   : > { %v294_v63 = vmul.f32 0.6931472, %v495_v61 }
  0x4f   : > { %v497_v1 = vpop.eup %496 }
  0x50   : > { %v296_v2 = vmul.f32 0.6931472, %v497_v1  ;;  %v297_v3 = vsub.f32 %v294_v63, %v285_v60 }
  0x52   : > { %v298_v4 = vsub.f32 %v296_v2, %v292_v62  ;;  %v318_v6 = vsub.f32 0.0, %v297_v3 }
  0x54   : > { %v301_v7 = vcombine.low %v297_v3, %v298_v4  ;;  %v319_v8 = vsub.f32 0.0, %v298_v4  ;;  %v320_v9 = vmul.f32 1.442695, %v318_v6 }
  0x56   : > { %v308_v10 = vrot.slane %v301_v7, %v307_v5  ;;  %498 = vpow2.f32 %v320_v9  ;;  %v322_v11 = vmul.f32 1.442695, %v319_v8 }
  0x58   : > { %v315_v12 = vrot.slane %v308_v10, %v307_v5  ;;  %500 = vpow2.f32 %v322_v11 }
  0x5a   : > { %v317_v13 = vsel %vm218_vm1, %v315_v12, 0.0 }
  0x5b   : > { %328 = vst.msk [vmem:[%s214_s24] ss:$2 sm:$0x3] %vm326_vm4, %v317_v13 }
  0x63   : > { %v499_v14 = vpop.eup %498 }
  0x65   : > { %v501_v15 = vpop.eup %500 }
  0x66   : > { %v331_v16 = vcombine.low %v499_v14, %v501_v15 }
  0x68   : > { %v338_v18 = vrot.slane %v331_v16, %v307_v5 }
  0x6a   : > { %v345_v20 = vrot.slane %v338_v18, %v307_v5 }
  0x6c   : > { %461 = vst.msk [vmem:[%s214_s24 + $0x1] ss:$2 sm:$0x3] %vm326_vm4, %v345_v20 }
  0x6d PF: > { %s12_s11 = sadd.s32 1, %s524_s11   ;;  %s602_s9 = smov %s520_s10 }
  0x6e   : > { %p9_p5 = scmp.ge.s32.totalorder %s12_s11, 4   ;;  %s603_s10 = smov %s605_s12 }
  0x70   :  { %11 = sbr.rel (!%p9_p5) target bundleno = 2 (0x2), region = 62 }

</bundles_post_ra>
